<compile_context>
chip_gen: v5e
topology: v5e:2x2
jax: 0.10.0
libtpu: 0.0.40
codegen_flags: <defaults>
</compile_context>

<pallas_src>
import jax
import jax.numpy as jnp
from jax.experimental import pallas as pl
from jax.experimental.pallas import tpu as pltpu


N_NODES = 100
N_FEAT = 65                  # GCN weight is (65, 65); 100 * 65 = 6500
K_RAW = N_NODES * N_FEAT     # 6500
K_PAD = 6656                 # 52 * 128, lane-aligned padded fc1 input dim
H1 = 1024
H2 = 128
TK = 1664                    # 13 * 128 -> 4 reduction steps over K_PAD
BN_EPS = 1e-5


# ---------------------------------------------------------------------------
# Fused double-GCN kernel, batch-blocked:
#   for each graph in the block:
#     h1 = relu(A @ (X @ W1) + b1) ; out = relu(A @ (h1 @ W2) + b2)
# grid over batch blocks; whole (N, F) / (N, N) tiles per graph (tiny graph,
# weights + A tile < 100 KB).  Static unroll keeps every dot a plain 2-D MXU
# matmul (no 3-D dot_general / cross-tile reshapes to lower).
# ---------------------------------------------------------------------------
def _gcn2_kernel(x_ref, a_ref, w1_ref, b1_ref, w2_ref, b2_ref, o_ref):
    bb = x_ref.shape[0]
    w1 = w1_ref[...]
    b1 = b1_ref[...]
    w2 = w2_ref[...]
    b2 = b2_ref[...]
    for i in range(bb):                      # static unroll over batch block
        x = x_ref[i]                         # (N, F)
        a = a_ref[i]                         # (N, N)
        h = jnp.dot(x, w1, preferred_element_type=jnp.float32)
        h = jnp.dot(a, h, preferred_element_type=jnp.float32) + b1
        h = jnp.maximum(h, 0.0)
        h = jnp.dot(h, w2, preferred_element_type=jnp.float32)
        h = jnp.dot(a, h, preferred_element_type=jnp.float32) + b2
        o_ref[i] = jnp.maximum(h, 0.0).astype(o_ref.dtype)


def gcn_two_layers(x, a, w1, b1, w2, b2):
    B, N, F = x.shape
    bb = min(B, 8)
    if B % bb != 0:          # keep the grid exact; tiny kernel, B is small
        bb = 1
    # TODO(synk): F=65 means masked-lane stores inside this kernel; padding F
    # to 128 here (and slicing back before the flatten) only matters if the
    # GCN path ever dominates — it is ~1-2 us at these shapes.
    return pl.pallas_call(
        _gcn2_kernel,
        out_shape=jax.ShapeDtypeStruct((B, N, F), jnp.float32),
        grid_spec=pltpu.PrefetchScalarGridSpec(
            num_scalar_prefetch=0,
            grid=(B // bb,),
            in_specs=[
                pl.BlockSpec((bb, N, F), lambda i: (i, 0, 0)),
                pl.BlockSpec((bb, N, N), lambda i: (i, 0, 0)),
                pl.BlockSpec((F, F), lambda i: (0, 0)),
                pl.BlockSpec((1, F), lambda i: (0, 0)),
                pl.BlockSpec((F, F), lambda i: (0, 0)),
                pl.BlockSpec((1, F), lambda i: (0, 0)),
            ],
            out_specs=pl.BlockSpec((bb, N, F), lambda i: (i, 0, 0)),
        ),
        compiler_params=pltpu.CompilerParams(
            dimension_semantics=("parallel",)),
    )(x, a, w1, b1.reshape(1, F), w2, b2.reshape(1, F))


# ---------------------------------------------------------------------------
# Fully fused projection head:
#   Linear(6500->1024) + BN1d(1024) + ReLU + Linear(1024->128) + BN1d(128) + ReLU
# grid = (K_PAD // TK,): pure reduction over fc1's input dim.  fc1 partial
# products accumulate in a resident f32 VMEM scratch (B, 1024); the last-k
# epilogue applies bias + BN1 + ReLU, then runs fc2 (+ BN2 + ReLU) on the
# resident activations and writes the (B, 128) output block once.
# Weights arrive as bf16 blocks (halved HBM stream), MXU accumulates in f32.
# BN statistics are per-feature over the batch, so full-width tiles are
# self-contained (training-mode stats, biased variance, eps=1e-5).
# ---------------------------------------------------------------------------
def _proj_kernel(x_ref, w1_ref, b1_ref, g1_ref, be1_ref,
                 w2_ref, b2_ref, g2_ref, be2_ref, o_ref, acc_ref):
    k = pl.program_id(0)

    @pl.when(k == 0)
    def _():
        acc_ref[...] = jnp.zeros_like(acc_ref)

    # fc1 partial product: bf16 x bf16 on the MXU, f32 accumulation.
    acc_ref[...] += jnp.dot(x_ref[...].astype(jnp.bfloat16), w1_ref[...],
                            preferred_element_type=jnp.float32)

    @pl.when(k == pl.num_programs(0) - 1)
    def _():
        # ---- fc1 bias + BatchNorm1d(1024) + ReLU ----
        y = acc_ref[...] + b1_ref[...]                          # (B, 1024)
        mean = jnp.mean(y, axis=0, keepdims=True)
        var = jnp.mean((y - mean) ** 2, axis=0, keepdims=True)  # biased var
        y = (y - mean) * jax.lax.rsqrt(var + BN_EPS) * g1_ref[...] + be1_ref[...]
        h1 = jnp.maximum(y, 0.0)

        # ---- fc2 + BatchNorm1d(128) + ReLU ----
        z = jnp.dot(h1.astype(jnp.bfloat16), w2_ref[...],
                    preferred_element_type=jnp.float32) + b2_ref[...]
        mean2 = jnp.mean(z, axis=0, keepdims=True)
        var2 = jnp.mean((z - mean2) ** 2, axis=0, keepdims=True)
        z = (z - mean2) * jax.lax.rsqrt(var2 + BN_EPS) * g2_ref[...] + be2_ref[...]
        o_ref[...] = jnp.maximum(z, 0.0).astype(o_ref.dtype)


def proj_forward(x, w1, b1, g1, be1, w2, b2, g2, be2, *, tk=TK):
    """x: (B, K_PAD) f32, w1: (K_PAD, 1024) bf16, w2: (1024, 128) bf16."""
    B, K = x.shape
    n1 = w1.shape[1]
    n2 = w2.shape[1]
    assert K % tk == 0 and tk % 128 == 0
    return pl.pallas_call(
        _proj_kernel,
        out_shape=jax.ShapeDtypeStruct((B, n2), jnp.float32),
        grid_spec=pltpu.PrefetchScalarGridSpec(
            num_scalar_prefetch=0,
            grid=(K // tk,),
            in_specs=[
                pl.BlockSpec((B, tk), lambda k: (0, k)),      # activations (f32)
                pl.BlockSpec((tk, n1), lambda k: (k, 0)),     # fc1 weight (bf16)
                pl.BlockSpec((1, n1), lambda k: (0, 0)),      # fc1 bias
                pl.BlockSpec((1, n1), lambda k: (0, 0)),      # bn1 gamma
                pl.BlockSpec((1, n1), lambda k: (0, 0)),      # bn1 beta
                pl.BlockSpec((n1, n2), lambda k: (0, 0)),     # fc2 weight (bf16)
                pl.BlockSpec((1, n2), lambda k: (0, 0)),      # fc2 bias
                pl.BlockSpec((1, n2), lambda k: (0, 0)),      # bn2 gamma
                pl.BlockSpec((1, n2), lambda k: (0, 0)),      # bn2 beta
            ],
            out_specs=pl.BlockSpec((B, n2), lambda k: (0, 0)),
            scratch_shapes=[pltpu.VMEM((B, n1), jnp.float32)],
        ),
        compiler_params=pltpu.CompilerParams(
            dimension_semantics=("arbitrary",)),
    )(x, w1, b1.reshape(1, n1), g1.reshape(1, n1), be1.reshape(1, n1),
      w2, b2.reshape(1, n2), g2.reshape(1, n2), be2.reshape(1, n2))


# ---------------------------------------------------------------------------
# Parameter init (deterministic, mirrors the shapes in GraphModel.__init__).
# fc1_w is stored already zero-padded to (K_PAD, 1024) AND in bfloat16, so the
# forward pass never re-pads / re-casts / double-streams the big weight.
# ---------------------------------------------------------------------------
def init_params(key):
    ks = jax.random.split(key, 4)
    fc1_w = jax.random.normal(ks[2], (K_RAW, H1), jnp.float32) \
            * (1.0 / jnp.sqrt(float(K_RAW)))
    fc1_w_padded = jnp.pad(fc1_w, ((0, K_PAD - K_RAW), (0, 0)))
    fc2_w = jax.random.normal(ks[3], (H1, H2), jnp.float32) \
            * (1.0 / jnp.sqrt(float(H1)))
    return {
        # GCN(): weight ~ randn(65, 65), bias = zeros(65)
        "gcn1_w": jax.random.normal(ks[0], (N_FEAT, N_FEAT), jnp.float32),
        "gcn1_b": jnp.zeros((N_FEAT,), jnp.float32),
        "gcn2_w": jax.random.normal(ks[1], (N_FEAT, N_FEAT), jnp.float32),
        "gcn2_b": jnp.zeros((N_FEAT,), jnp.float32),
        # Linear(6500, 1024) / Linear(1024, 128) — weights stored bf16
        "fc1_w": fc1_w_padded.astype(jnp.bfloat16),   # (6656, 1024) bf16
        "fc1_b": jnp.zeros((H1,), jnp.float32),
        "fc2_w": fc2_w.astype(jnp.bfloat16),          # (1024, 128) bf16
        "fc2_b": jnp.zeros((H2,), jnp.float32),
        # BatchNorm1d affine params (PyTorch default init)
        "bn1_g": jnp.ones((H1,), jnp.float32),
        "bn1_b": jnp.zeros((H1,), jnp.float32),
        "bn2_g": jnp.ones((H2,), jnp.float32),
        "bn2_b": jnp.zeros((H2,), jnp.float32),
    }
    # TODO(synk): self.att = GraphAttentionLayer() is constructed in __init__
    # but never used in forward(), so it is intentionally omitted.


def graph_model_forward(params, X, A):
    # self.layers = Sequential(GCN(), GCN()); forward returns (out, A)[0]
    h = gcn_two_layers(X, A,
                       params["gcn1_w"], params["gcn1_b"],
                       params["gcn2_w"], params["gcn2_b"])

    B = h.shape[0]
    h = h.reshape(B, -1)                                  # (B, 6500), row-major

    # Zero-pad the tiny activation (B x 6500 -> B x 6656); the padded rows of
    # fc1_w are zero so the result is exact.
    h_p = jnp.pad(h, ((0, 0), (0, K_PAD - K_RAW)))

    # Entire projection head (fc1+BN1+ReLU+fc2+BN2+ReLU) in one fused call.
    return proj_forward(h_p, params["fc1_w"], params["fc1_b"],
                        params["bn1_g"], params["bn1_b"],
                        params["fc2_w"], params["fc2_b"],
                        params["bn2_g"], params["bn2_b"], tk=TK)


if __name__ == "__main__":
    key = jax.random.PRNGKey(0)
    k_param, k_x, k_a = jax.random.split(key, 3)

    params = init_params(k_param)

    B = 2
    X = jax.random.normal(k_x, (B, N_NODES, N_FEAT), jnp.float32)
    A = jax.random.uniform(k_a, (B, N_NODES, N_NODES), jnp.float32)

    out = graph_model_forward(params, X, A)
    out = jax.block_until_ready(out)
    assert out.shape == (B, 128) and out.dtype == jnp.float32
    print("KERNEL_OK")
</pallas_src>

<mosaic_0001>
module attributes {stable_mosaic.version = 11 : i64} {
  func.func @_gcn2_kernel(%arg0: i32, %arg1: memref<2x100x65xf32, #tpu.memory_space<vmem>>, %arg2: memref<2x100x100xf32, #tpu.memory_space<vmem>>, %arg3: memref<65x65xf32, #tpu.memory_space<vmem>>, %arg4: memref<1x65xf32, #tpu.memory_space<vmem>>, %arg5: memref<65x65xf32, #tpu.memory_space<vmem>>, %arg6: memref<1x65xf32, #tpu.memory_space<vmem>>, %arg7: memref<2x100x65xf32, #tpu.memory_space<vmem>>) attributes {dimension_semantics = [#tpu.dimension_semantics<parallel>], iteration_bounds = array<i64: 1>, scalar_prefetch = 0 : i64, scratch_operands = 0 : i64, tpu.core_type = #tpu.core_type<tc>, window_params = [{transform_indices = @transform_0, window_bounds = array<i64: 2, 100, 65>}, {transform_indices = @transform_1, window_bounds = array<i64: 2, 100, 100>}, {pipeline_mode = #tpu.pipeline_mode<synchronous>, transform_indices = @transform_2, window_bounds = array<i64: 65, 65>}, {pipeline_mode = #tpu.pipeline_mode<synchronous>, transform_indices = @transform_3, window_bounds = array<i64: 1, 65>}, {pipeline_mode = #tpu.pipeline_mode<synchronous>, transform_indices = @transform_4, window_bounds = array<i64: 65, 65>}, {pipeline_mode = #tpu.pipeline_mode<synchronous>, transform_indices = @transform_5, window_bounds = array<i64: 1, 65>}, {transform_indices = @transform_6, window_bounds = array<i64: 2, 100, 65>}]} {
    %c0 = arith.constant 0 : index
    %c0_0 = arith.constant 0 : index
    %0 = vector.load %arg3[%c0, %c0_0] : memref<65x65xf32, #tpu.memory_space<vmem>>, vector<65x65xf32>
    %c0_1 = arith.constant 0 : index
    %c0_2 = arith.constant 0 : index
    %1 = vector.load %arg4[%c0_1, %c0_2] : memref<1x65xf32, #tpu.memory_space<vmem>>, vector<1x65xf32>
    %c0_3 = arith.constant 0 : index
    %c0_4 = arith.constant 0 : index
    %2 = vector.load %arg5[%c0_3, %c0_4] : memref<65x65xf32, #tpu.memory_space<vmem>>, vector<65x65xf32>
    %c0_5 = arith.constant 0 : index
    %c0_6 = arith.constant 0 : index
    %3 = vector.load %arg6[%c0_5, %c0_6] : memref<1x65xf32, #tpu.memory_space<vmem>>, vector<1x65xf32>
    %c0_7 = arith.constant 0 : index
    %c0_8 = arith.constant 0 : index
    %c0_9 = arith.constant 0 : index
    %4 = vector.load %arg1[%c0_7, %c0_8, %c0_9] : memref<2x100x65xf32, #tpu.memory_space<vmem>>, vector<1x100x65xf32>
    %5 = vector.shape_cast %4 : vector<1x100x65xf32> to vector<100x65xf32>
    %c0_10 = arith.constant 0 : index
    %c0_11 = arith.constant 0 : index
    %c0_12 = arith.constant 0 : index
    %6 = vector.load %arg2[%c0_10, %c0_11, %c0_12] : memref<2x100x100xf32, #tpu.memory_space<vmem>>, vector<1x100x100xf32>
    %7 = vector.shape_cast %6 : vector<1x100x100xf32> to vector<100x100xf32>
    %cst = arith.constant dense<0.000000e+00> : vector<100x65xf32>
    %8 = tpu.matmul %5, %0, %cst {dimension_numbers = #tpu.dot_dimension_numbers<[1], [0], [0], [1], [0, 0, 1, 1], [], []>} : vector<100x65xf32>, vector<65x65xf32>, vector<100x65xf32> -> vector<100x65xf32>
    %cst_13 = arith.constant dense<0.000000e+00> : vector<100x65xf32>
    %9 = tpu.matmul %7, %8, %cst_13 {dimension_numbers = #tpu.dot_dimension_numbers<[1], [0], [0], [1], [0, 0, 1, 1], [], []>} : vector<100x100xf32>, vector<100x65xf32>, vector<100x65xf32> -> vector<100x65xf32>
    %10 = vector.broadcast %1 : vector<1x65xf32> to vector<100x65xf32>
    %11 = arith.addf %9, %10 : vector<100x65xf32>
    %cst_14 = arith.constant 0.000000e+00 : f32
    %12 = vector.broadcast %cst_14 : f32 to vector<100x65xf32>
    %13 = arith.maximumf %11, %12 : vector<100x65xf32>
    %cst_15 = arith.constant dense<0.000000e+00> : vector<100x65xf32>
    %14 = tpu.matmul %13, %2, %cst_15 {dimension_numbers = #tpu.dot_dimension_numbers<[1], [0], [0], [1], [0, 0, 1, 1], [], []>} : vector<100x65xf32>, vector<65x65xf32>, vector<100x65xf32> -> vector<100x65xf32>
    %cst_16 = arith.constant dense<0.000000e+00> : vector<100x65xf32>
    %15 = tpu.matmul %7, %14, %cst_16 {dimension_numbers = #tpu.dot_dimension_numbers<[1], [0], [0], [1], [0, 0, 1, 1], [], []>} : vector<100x100xf32>, vector<100x65xf32>, vector<100x65xf32> -> vector<100x65xf32>
    %16 = vector.broadcast %3 : vector<1x65xf32> to vector<100x65xf32>
    %17 = arith.addf %15, %16 : vector<100x65xf32>
    %cst_17 = arith.constant 0.000000e+00 : f32
    %18 = vector.broadcast %cst_17 : f32 to vector<100x65xf32>
    %19 = arith.maximumf %17, %18 : vector<100x65xf32>
    %c0_18 = arith.constant 0 : index
    %c0_19 = arith.constant 0 : index
    %c0_20 = arith.constant 0 : index
    %20 = vector.load %arg7[%c0_18, %c0_19, %c0_20] : memref<2x100x65xf32, #tpu.memory_space<vmem>>, vector<1x100x65xf32>
    %21 = vector.shape_cast %20 : vector<1x100x65xf32> to vector<100x65xf32>
    %22 = vector.shape_cast %19 : vector<100x65xf32> to vector<1x100x65xf32>
    tpu.vector_store %arg7[%c0_18, %c0_19, %c0_20], %22 {strides = array<i32>} : memref<2x100x65xf32, #tpu.memory_space<vmem>>, vector<1x100x65xf32>,
    %c1 = arith.constant 1 : index
    %c0_21 = arith.constant 0 : index
    %c0_22 = arith.constant 0 : index
    %23 = vector.load %arg1[%c1, %c0_21, %c0_22] : memref<2x100x65xf32, #tpu.memory_space<vmem>>, vector<1x100x65xf32>
    %24 = vector.shape_cast %23 : vector<1x100x65xf32> to vector<100x65xf32>
    %c1_23 = arith.constant 1 : index
    %c0_24 = arith.constant 0 : index
    %c0_25 = arith.constant 0 : index
    %25 = vector.load %arg2[%c1_23, %c0_24, %c0_25] : memref<2x100x100xf32, #tpu.memory_space<vmem>>, vector<1x100x100xf32>
    %26 = vector.shape_cast %25 : vector<1x100x100xf32> to vector<100x100xf32>
    %cst_26 = arith.constant dense<0.000000e+00> : vector<100x65xf32>
    %27 = tpu.matmul %24, %0, %cst_26 {dimension_numbers = #tpu.dot_dimension_numbers<[1], [0], [0], [1], [0, 0, 1, 1], [], []>} : vector<100x65xf32>, vector<65x65xf32>, vector<100x65xf32> -> vector<100x65xf32>
    %cst_27 = arith.constant dense<0.000000e+00> : vector<100x65xf32>
    %28 = tpu.matmul %26, %27, %cst_27 {dimension_numbers = #tpu.dot_dimension_numbers<[1], [0], [0], [1], [0, 0, 1, 1], [], []>} : vector<100x100xf32>, vector<100x65xf32>, vector<100x65xf32> -> vector<100x65xf32>
    %29 = vector.broadcast %1 : vector<1x65xf32> to vector<100x65xf32>
    %30 = arith.addf %28, %29 : vector<100x65xf32>
    %cst_28 = arith.constant 0.000000e+00 : f32
    %31 = vector.broadcast %cst_28 : f32 to vector<100x65xf32>
    %32 = arith.maximumf %30, %31 : vector<100x65xf32>
    %cst_29 = arith.constant dense<0.000000e+00> : vector<100x65xf32>
    %33 = tpu.matmul %32, %2, %cst_29 {dimension_numbers = #tpu.dot_dimension_numbers<[1], [0], [0], [1], [0, 0, 1, 1], [], []>} : vector<100x65xf32>, vector<65x65xf32>, vector<100x65xf32> -> vector<100x65xf32>
    %cst_30 = arith.constant dense<0.000000e+00> : vector<100x65xf32>
    %34 = tpu.matmul %26, %33, %cst_30 {dimension_numbers = #tpu.dot_dimension_numbers<[1], [0], [0], [1], [0, 0, 1, 1], [], []>} : vector<100x100xf32>, vector<100x65xf32>, vector<100x65xf32> -> vector<100x65xf32>
    %35 = vector.broadcast %3 : vector<1x65xf32> to vector<100x65xf32>
    %36 = arith.addf %34, %35 : vector<100x65xf32>
    %cst_31 = arith.constant 0.000000e+00 : f32
    %37 = vector.broadcast %cst_31 : f32 to vector<100x65xf32>
    %38 = arith.maximumf %36, %37 : vector<100x65xf32>
    %c1_32 = arith.constant 1 : index
    %c0_33 = arith.constant 0 : index
    %c0_34 = arith.constant 0 : index
    %39 = vector.load %arg7[%c1_32, %c0_33, %c0_34] : memref<2x100x65xf32, #tpu.memory_space<vmem>>, vector<1x100x65xf32>
    %40 = vector.shape_cast %39 : vector<1x100x65xf32> to vector<100x65xf32>
    %41 = vector.shape_cast %38 : vector<100x65xf32> to vector<1x100x65xf32>
    tpu.vector_store %arg7[%c1_32, %c0_33, %c0_34], %41 {strides = array<i32>} : memref<2x100x65xf32, #tpu.memory_space<vmem>>, vector<1x100x65xf32>,
    return
  }
  func.func @transform_0(%arg0: i32) -> (i32, i32, i32) {
    %c0_i32 = arith.constant 0 : i32
    %c0_i32_0 = arith.constant 0 : i32
    %c0_i32_1 = arith.constant 0 : i32
    return %arg0, %c0_i32, %c0_i32_0 : i32, i32, i32
  }
  func.func @transform_1(%arg0: i32) -> (i32, i32, i32) {
    %c0_i32 = arith.constant 0 : i32
    %c0_i32_0 = arith.constant 0 : i32
    %c0_i32_1 = arith.constant 0 : i32
    return %arg0, %c0_i32, %c0_i32_0 : i32, i32, i32
  }
  func.func @transform_2(%arg0: i32) -> (i32, i32) {
    %c0_i32 = arith.constant 0 : i32
    %c0_i32_0 = arith.constant 0 : i32
    %c0_i32_1 = arith.constant 0 : i32
    return %c0_i32, %c0_i32_0 : i32, i32
  }
  func.func @transform_3(%arg0: i32) -> (i32, i32) {
    %c0_i32 = arith.constant 0 : i32
    %c0_i32_0 = arith.constant 0 : i32
    %c0_i32_1 = arith.constant 0 : i32
    return %c0_i32, %c0_i32_0 : i32, i32
  }
  func.func @transform_4(%arg0: i32) -> (i32, i32) {
    %c0_i32 = arith.constant 0 : i32
    %c0_i32_0 = arith.constant 0 : i32
    %c0_i32_1 = arith.constant 0 : i32
    return %c0_i32, %c0_i32_0 : i32, i32
  }
  func.func @transform_5(%arg0: i32) -> (i32, i32) {
    %c0_i32 = arith.constant 0 : i32
    %c0_i32_0 = arith.constant 0 : i32
    %c0_i32_1 = arith.constant 0 : i32
    return %c0_i32, %c0_i32_0 : i32, i32
  }
  func.func @transform_6(%arg0: i32) -> (i32, i32, i32) {
    %c0_i32 = arith.constant 0 : i32
    %c0_i32_0 = arith.constant 0 : i32
    %c0_i32_1 = arith.constant 0 : i32
    return %arg0, %c0_i32, %c0_i32_0 : i32, i32, i32
  }
}

</mosaic_0001>

<bundles_post_ra>
// kernel: tpu_custom_call.1
= control target key start
LH: loop header
LB: loop body
LE: loop exit
PB: predicated region body
PF: predicated region fallthrough
CT: control target
= control target key end

     0   :  { %vm109_vm0 = vcmask 1040384   ;;  %vm69_vm1 = vcmask 531456   ;;  %vm212_vm2 = vcmask 1043456   ;;  %vm172_vm3 = vcmask 818176   ;;  %s1686_s2 = inlined_call_operand.vmem [shape: f32[65,65], index: 2, kind: input, shape index: {}]   ;;  %s1687_s0 = inlined_call_operand.vmem [shape: f32[2,100,65], index: 0, kind: input, shape index: {}]   ;;  %s1688_s3 = inlined_call_operand.vmem [shape: f32[1,65], index: 3, kind: input, shape index: {}]   ;;  %s1689_s1 = inlined_call_operand.vmem [shape: f32[2,100,100], index: 1, kind: input, shape index: {}]   ;;  %s1690_s4 = inlined_call_operand.vmem [shape: f32[65,65], index: 4, kind: input, shape index: {}]   ;;  %s1691_s5 = inlined_call_operand.vmem [shape: f32[1,65], index: 5, kind: input, shape index: {}]   ;;  %s1692_s6 = inlined_call_operand.vmem [shape: f32[2,100,65], index: 6, kind: output, shape index: {}]  }
   0x1   :  { %v31_v0 = vld [vmem:[%s1686_s2 + $0x40] sm:$0x1]  ;;  %v30_v1 = vld [vmem:[%s1686_s2 + $0x38] sm:$0xff]  ;;  %v29_v2 = vld [vmem:[%s1686_s2 + $0x30] sm:$0xff]  ;;  %vm470_vm4 = vcmask 527360  }
   0x2   :  { %891 = vmatpush.msk.msra.mxu0 %vm109_vm0, %v31_v0  ;;  %v28_v3 = vld [vmem:[%s1686_s2 + $0x28] sm:$0xff]  ;;  %v27_v4 = vld [vmem:[%s1686_s2 + $0x20] sm:$0xff]  ;;  %v26_v5 = vld [vmem:[%s1686_s2 + $0x18] sm:$0xff] }
   0x3   :  { %v25_v6 = vld [vmem:[%s1686_s2 + $0x10] sm:$0xff]  ;;  %v24_v7 = vld [vmem:[%s1686_s2 + $0x8] sm:$0xff]  ;;  %v23_v8 = vld [vmem:[%s1686_s2] sm:$0xff] }
   0x4   :  { %121 = vmatpush.msra.mxu0 %v30_v1  ;;  %v43_v9 = vld [vmem:[%s1687_s0] sm:$0xff]  ;;  %v44_v10 = vld [vmem:[%s1687_s0 + $0x8] sm:$0xff]  ;;  %v45_v11 = vld [vmem:[%s1687_s0 + $0x10] sm:$0xff] }
   0x5   :  { %v46_v12 = vld [vmem:[%s1687_s0 + $0x18] sm:$0xff]  ;;  %v47_v13 = vld [vmem:[%s1687_s0 + $0x20] sm:$0xff]  ;;  %v48_v14 = vld [vmem:[%s1687_s0 + $0x28] sm:$0xff] }
   0x6   :  { %122 = vmatpush.msra.mxu0 %v29_v2  ;;  %v49_v15 = vld [vmem:[%s1687_s0 + $0x30] sm:$0xff]  ;;  %v50_v16 = vld [vmem:[%s1687_s0 + $0x38] sm:$0xff]  ;;  %v51_v17 = vld [vmem:[%s1687_s0 + $0x40] sm:$0xff] }
   0x7   :  { %v52_v18 = vld [vmem:[%s1687_s0 + $0x48] sm:$0xff]  ;;  %v53_v19 = vld [vmem:[%s1687_s0 + $0x50] sm:$0xff]  ;;  %v54_v20 = vld [vmem:[%s1687_s0 + $0x58] sm:$0xff] }
   0x8   :  { %123 = vmatpush.msra.mxu0 %v28_v3  ;;  %v55_v21 = vld [vmem:[%s1687_s0 + $0x60] sm:$0xf]  ;;  %v947_v22 = vld [vmem:[%s1687_s0 + $0x68] sm:$0xff]  ;;  %v948_v23 = vld [vmem:[%s1687_s0 + $0x70] sm:$0xff] }
   0x9   :  { %v949_v24 = vld [vmem:[%s1687_s0 + $0x78] sm:$0xff]  ;;  %v950_v26 = vld [vmem:[%s1687_s0 + $0x80] sm:$0xff]  ;;  %v951_v28 = vld [vmem:[%s1687_s0 + $0x88] sm:$0xff] }
   0xa   :  { %124 = vmatpush.msra.mxu0 %v27_v4  ;;  %v952_v30 = vld [vmem:[%s1687_s0 + $0x90] sm:$0xff]  ;;  %v953_v32 = vld [vmem:[%s1687_s0 + $0x98] sm:$0xff]  ;;  %v954_v34 = vld [vmem:[%s1687_s0 + $0xa0] sm:$0xff] }
   0xb   :  { %v955_v36 = vld [vmem:[%s1687_s0 + $0xa8] sm:$0xff]  ;;  %v956_v38 = vld [vmem:[%s1687_s0 + $0xb0] sm:$0xff]  ;;  %v957_v40 = vld [vmem:[%s1687_s0 + $0xb8] sm:$0xff] }
   0xc   :  { %125 = vmatpush.msra.mxu0 %v26_v5  ;;  %v958_v42 = vld [vmem:[%s1687_s0 + $0xc0] sm:$0xff]  ;;  %v959_v44 = vld [vmem:[%s1687_s0 + $0xc8] sm:$0xf]  ;;  %v1238_v54 = vld [vmem:[%s1689_s1 + $0x10] sm:$0xff] }
   0xd   :  { %v1220_v50 = vld [vmem:[%s1689_s1] sm:$0xff]  ;;  %v1229_v52 = vld [vmem:[%s1689_s1 + $0x8] sm:$0xff]  ;;  %v1247_v56 = vld [vmem:[%s1689_s1 + $0x18] sm:$0xff] }
   0xe   :  { %126 = vmatpush.msra.mxu0 %v25_v6  ;;  %v1254_v58 = vld [vmem:[%s1689_s1 + $0x20] sm:$0xff]  ;;  %v1261_v60 = vld [vmem:[%s1689_s1 + $0x28] sm:$0xff]  ;;  %v40_v63 = vld [vmem:[%s1690_s4 + $0x38] sm:$0xff] }
   0xf   :  { %v41_v62 = vld [vmem:[%s1690_s4 + $0x40] sm:$0x1] }
  0x10   :  { %127 = vmatpush.msra.mxu0 %v24_v7  ;;  %919 = vmatpush.msk.msra.mxu2 %vm109_vm0, %v41_v62 }
  0x12   :  { %128 = vmatpush.msra.mxu0 %v23_v8  ;;  %335 = vmatpush.msra.mxu2 %v40_v63 }
  0x13   :  { %892 = vmatmul.msk.f32.vlgmr.msra.gmra.mxu0 %vm69_vm1, %v43_v9 }
  0x14   :  { %973 = vmatpush.msk.msrb.mxu0 %vm109_vm0, %v31_v0  ;;  %v39_v0 = vld [vmem:[%s1690_s4 + $0x30] sm:$0xff] }
  0x15   :  { %336 = vmatpush.msra.mxu2 %v39_v0 }
  0x16   :  { %547 = vmatpush.msrb.mxu0 %v30_v1  ;;  %v38_v1 = vld [vmem:[%s1690_s4 + $0x28] sm:$0xff] }
  0x17   :  { %337 = vmatpush.msra.mxu2 %v38_v1 }
  0x18   :  { %548 = vmatpush.msrb.mxu0 %v29_v2  ;;  %v1282_v2 = vld [vmem:[%s1689_s1 + $0x30] sm:$0xff] }
  0x1a   :  { %549 = vmatpush.msrb.mxu0 %v28_v3 }
  0x1b   :  { %893 = vmatmul.msk.f32.gmra.mxu0 %vm69_vm1, %v44_v10  ;;  %v33_v10 = vld [vmem:[%s1690_s4] sm:$0xff] }
  0x1c   :  { %550 = vmatpush.msrb.mxu0 %v27_v4  ;;  %v37_v4 = vld [vmem:[%s1690_s4 + $0x20] sm:$0xff] }
  0x1d   :  { %338 = vmatpush.msra.mxu2 %v37_v4 }
  0x1e   :  { %551 = vmatpush.msrb.mxu0 %v26_v5  ;;  %v36_v5 = vld [vmem:[%s1690_s4 + $0x18] sm:$0xff] }
  0x1f   :  { %339 = vmatpush.msra.mxu2 %v36_v5 }
  0x20   :  { %552 = vmatpush.msrb.mxu0 %v25_v6  ;;  %v35_v6 = vld [vmem:[%s1690_s4 + $0x10] sm:$0xff] }
  0x21   :  { %340 = vmatpush.msra.mxu2 %v35_v6 }
  0x22   :  { %553 = vmatpush.msrb.mxu0 %v24_v7  ;;  %v34_v7 = vld [vmem:[%s1690_s4 + $0x8] sm:$0xff] }
  0x23   :  { %894 = vmatmul.msk.f32.gmra.mxu0 %vm69_vm1, %v45_v11  ;;  %341 = vmatpush.msra.mxu2 %v34_v7  ;;  %v1311_v11 = vld [vmem:[%s1689_s1 + $0x40] sm:$0xff] }
  0x24   :  { %554 = vmatpush.msrb.mxu0 %v23_v8  ;;  %v1301_v8 = vld [vmem:[%s1689_s1 + $0x38] sm:$0xff] }
  0x25   :  { %342 = vmatpush.msra.mxu2 %v33_v10 }
  0x2b   :  { %895 = vmatmul.msk.f32.gmra.mxu0 %vm69_vm1, %v46_v12 }
  0x33   :  { %896 = vmatmul.msk.f32.gmra.mxu0 %vm69_vm1, %v47_v13  ;;  %v1318_v13 = vld [vmem:[%s1689_s1 + $0x48] sm:$0xff] }
  0x3b   :  { %897 = vmatmul.msk.f32.gmra.mxu0 %vm69_vm1, %v48_v14 }
  0x43   :  { %898 = vmatmul.msk.f32.gmra.mxu0 %vm69_vm1, %v49_v15  ;;  %v1325_v15 = vld [vmem:[%s1689_s1 + $0x50] sm:$0xff] }
  0x4b   :  { %899 = vmatmul.msk.f32.gmra.mxu0 %vm69_vm1, %v50_v16 }
  0x53   :  { %900 = vmatmul.msk.f32.gmra.mxu0 %vm69_vm1, %v51_v17  ;;  %v1333_v17 = vld [vmem:[%s1689_s1 + $0x58] sm:$0xff] }
  0x5b   :  { %901 = vmatmul.msk.f32.gmra.mxu0 %vm69_vm1, %v52_v18  ;;  %v1340_v18 = vld [vmem:[%s1689_s1 + $0x60] sm:$0xf] }
  0x63   :  { %902 = vmatmul.msk.f32.gmra.mxu0 %vm69_vm1, %v53_v19  ;;  %v1352_v19 = vld [vmem:[%s1688_s3] ss:$0 sm:$0xff] }
  0x6b   :  { %903 = vmatmul.msk.f32.gmra.mxu0 %vm69_vm1, %v54_v20 }
  0x73   :  { %904 = vmatmul.msk.f32.gmra.mxu0 %vm69_vm1, %v55_v21 }
  0x7b   :  { %974 = vmatmul.msk.f32.vlgmr.msrb.gmra.mxu0 %vm69_vm1, %v947_v22 }
  0x83   :  { %975 = vmatmul.msk.f32.gmra.mxu0 %vm69_vm1, %v948_v23 }
  0x8b   :  { %976 = vmatmul.msk.f32.gmra.mxu0 %vm69_vm1, %v949_v24 }
  0x90   :  { %v130_v25 = vpop.f32.mrf.mxu0 }
  0x93   :  { %977 = vmatmul.msk.f32.gmra.mxu0 %vm69_vm1, %v950_v26 }
  0x98   :  { %v133_v27 = vpop.f32.mrf.mxu0 }
  0x9b   :  { %978 = vmatmul.msk.f32.gmra.mxu0 %vm69_vm1, %v951_v28 }
  0xa0   :  { %v136_v29 = vpop.f32.mrf.mxu0 }
  0xa3   :  { %979 = vmatmul.msk.f32.gmra.mxu0 %vm69_vm1, %v952_v30 }
  0xa8   :  { %v139_v31 = vpop.f32.mrf.mxu0 }
  0xab   :  { %980 = vmatmul.msk.f32.gmra.mxu0 %vm69_vm1, %v953_v32 }
  0xb0   :  { %v142_v33 = vpop.f32.mrf.mxu0 }
  0xb3   :  { %981 = vmatmul.msk.f32.gmra.mxu0 %vm69_vm1, %v954_v34 }
  0xb8   :  { %v145_v35 = vpop.f32.mrf.mxu0 }
  0xbb   :  { %982 = vmatmul.msk.f32.gmra.mxu0 %vm69_vm1, %v955_v36 }
  0xc0   :  { %v148_v37 = vpop.f32.mrf.mxu0 }
  0xc3   :  { %983 = vmatmul.msk.f32.gmra.mxu0 %vm69_vm1, %v956_v38 }
  0xc8   :  { %v151_v39 = vpop.f32.mrf.mxu0 }
  0xcb   :  { %984 = vmatmul.msk.f32.gmra.mxu0 %vm69_vm1, %v957_v40 }
  0xd0   :  { %v154_v41 = vpop.f32.mrf.mxu0 }
  0xd3   :  { %985 = vmatmul.msk.f32.gmra.mxu0 %vm69_vm1, %v958_v42 }
  0xd8   :  { %v157_v43 = vpop.f32.mrf.mxu0 }
  0xdb   :  { %986 = vmatmul.msk.f32.gmra.mxu0 %vm69_vm1, %v959_v44 }
  0xe0   :  { %v160_v45 = vpop.f32.mrf.mxu0 }
  0xe8   :  { %v163_v46 = vpop.f32.mrf.mxu0 }
  0xf0   :  { %v166_v47 = vpop.f32.mrf.mxu0 }
  0xf1   :  { %905 = vmatpush.msk.msra.mxu1 %vm212_vm2, %v166_v47 }
  0xf3   :  { %220 = vmatpush.msra.mxu1 %v163_v46 }
  0xf5   :  { %221 = vmatpush.msra.mxu1 %v160_v45 }
  0xf7   :  { %222 = vmatpush.msra.mxu1 %v157_v43 }
  0xf8   :  { %v1213_v48 = vpop.f32.mrf.mxu0 }
  0xf9   :  { %223 = vmatpush.msra.mxu1 %v154_v41 }
  0xfb   :  { %224 = vmatpush.msra.mxu1 %v151_v39 }
  0xfd   :  { %225 = vmatpush.msra.mxu1 %v148_v37 }
  0xff   :  { %226 = vmatpush.msra.mxu1 %v145_v35 }
 0x100   :  { %v1215_v49 = vpop.f32.mrf.mxu0 }
 0x101   :  { %227 = vmatpush.msra.mxu1 %v142_v33 }
 0x103   :  { %228 = vmatpush.msra.mxu1 %v139_v31 }
 0x105   :  { %229 = vmatpush.msra.mxu1 %v136_v29 }
 0x107   :  { %230 = vmatpush.msra.mxu1 %v133_v27 }
 0x108   :  { %v1222_v51 = vpop.f32.mrf.mxu0 }
 0x109   :  { %231 = vmatpush.msra.mxu1 %v130_v25 }
 0x10a   :  { %906 = vmatmul.msk.f32.vlgmr.msra.gmra.mxu1 %vm172_vm3, %v1220_v50 }
 0x10b   :  { %1001 = vmatpush.msk.msrb.mxu1 %vm109_vm0, %v41_v62 }
 0x10d   :  { %753 = vmatpush.msrb.mxu1 %v40_v63 }
 0x10f   :  { %754 = vmatpush.msrb.mxu1 %v39_v0 }
 0x110   :  { %v1231_v53 = vpop.f32.mrf.mxu0 }
 0x111   :  { %755 = vmatpush.msrb.mxu1 %v38_v1  ;;  %v1383_v1 = vld [vmem:[%s1689_s1 + $0x68] sm:$0xff] }
 0x112   :  { %907 = vmatmul.msk.f32.gmra.mxu1 %vm172_vm3, %v1229_v52 }
 0x113   :  { %756 = vmatpush.msrb.mxu1 %v37_v4  ;;  %v1397_v4 = vld [vmem:[%s1689_s1 + $0x78] sm:$0xff] }
 0x115   :  { %757 = vmatpush.msrb.mxu1 %v36_v5  ;;  %v1404_v5 = vld [vmem:[%s1689_s1 + $0x80] sm:$0xff] }
 0x117   :  { %758 = vmatpush.msrb.mxu1 %v35_v6 }
 0x118   :  { %v1240_v55 = vpop.f32.mrf.mxu0 }
 0x119   :  { %759 = vmatpush.msrb.mxu1 %v34_v7  ;;  %v1411_v7 = vld [vmem:[%s1689_s1 + $0x88] sm:$0xff] }
 0x11a   :  { %908 = vmatmul.msk.f32.gmra.mxu1 %vm172_vm3, %v1238_v54 }
 0x11b   :  { %760 = vmatpush.msrb.mxu1 %v33_v10  ;;  %v1418_v10 = vld [vmem:[%s1689_s1 + $0x90] sm:$0xff] }
 0x120   :  { %v571_v57 = vpop.f32.mrf.mxu0 }
 0x122   :  { %909 = vmatmul.msk.f32.gmra.mxu1 %vm172_vm3, %v1247_v56 }
 0x128   :  { %v574_v59 = vpop.f32.mrf.mxu0 }
 0x12a   :  { %910 = vmatmul.msk.f32.gmra.mxu1 %vm172_vm3, %v1254_v58 }
 0x130   :  { %v577_v61 = vpop.f32.mrf.mxu0 }
 0x132   :  { %911 = vmatmul.msk.f32.gmra.mxu1 %vm172_vm3, %v1261_v60 }
 0x138   :  { %v580_v3 = vpop.f32.mrf.mxu0 }
 0x13a   :  { %912 = vmatmul.msk.f32.gmra.mxu1 %vm172_vm3, %v1282_v2 }
 0x140   :  { %v583_v9 = vpop.f32.mrf.mxu0 }
 0x142   :  { %913 = vmatmul.msk.f32.gmra.mxu1 %vm172_vm3, %v1301_v8 }
 0x148   :  { %v586_v12 = vpop.f32.mrf.mxu0 }
 0x14a   :  { %914 = vmatmul.msk.f32.gmra.mxu1 %vm172_vm3, %v1311_v11 }
 0x150   :  { %v589_v14 = vpop.f32.mrf.mxu0 }
 0x152   :  { %915 = vmatmul.msk.f32.gmra.mxu1 %vm172_vm3, %v1318_v13 }
 0x158   :  { %v592_v16 = vpop.f32.mrf.mxu0 }
 0x159   :  { %987 = vmatpush.msk.msrb.mxu2 %vm212_vm2, %v592_v16 }
 0x15a   :  { %916 = vmatmul.msk.f32.gmra.mxu1 %vm172_vm3, %v1325_v15 }
 0x15b   :  { %641 = vmatpush.msrb.mxu2 %v589_v14  ;;  %v1425_v14 = vld [vmem:[%s1689_s1 + $0x98] sm:$0xff] }
 0x15d   :  { %642 = vmatpush.msrb.mxu2 %v586_v12 }
 0x15f   :  { %643 = vmatpush.msrb.mxu2 %v583_v9 }
 0x161   :  { %644 = vmatpush.msrb.mxu2 %v580_v3  ;;  %v1390_v3 = vld [vmem:[%s1689_s1 + $0x70] sm:$0xff] }
 0x162   :  { %917 = vmatmul.msk.f32.gmra.mxu1 %vm172_vm3, %v1333_v17 }
 0x163   :  { %645 = vmatpush.msrb.mxu2 %v577_v61 }
 0x165   :  { %646 = vmatpush.msrb.mxu2 %v574_v59 }
 0x167   :  { %647 = vmatpush.msrb.mxu2 %v571_v57 }
 0x169   :  { %648 = vmatpush.msrb.mxu2 %v1240_v55 }
 0x16a   :  { %918 = vmatmul.msk.f32.gmra.mxu1 %vm172_vm3, %v1340_v18 }
 0x16b   :  { %649 = vmatpush.msrb.mxu2 %v1231_v53 }
 0x16d   :  { %650 = vmatpush.msrb.mxu2 %v1222_v51 }
 0x16f   :  { %651 = vmatpush.msrb.mxu2 %v1215_v49 }
 0x171   :  { %652 = vmatpush.msrb.mxu2 %v1213_v48 }
 0x187   :  { %v233_v20 = vpop.f32.mrf.mxu1 }
 0x188   :  { %v234_v21 = vadd.f32 %v1352_v19, %v233_v20  ;;  %v1432_v20 = vld [vmem:[%s1689_s1 + $0xa0] sm:$0xff] }
 0x18a   :  { %v272_v22 = vmax.f32 %v234_v21, 0.0 }
 0x18c   :  { %920 = vmatmul.msk.f32.vlgmr.msra.gmra.mxu2 %vm69_vm1, %v272_v22  ;;  %v1439_v22 = vld [vmem:[%s1689_s1 + $0xa8] sm:$0xff] }
 0x18f   :  { %v236_v23 = vpop.f32.mrf.mxu1 }
 0x190   :  { %v237_v24 = vadd.f32 %v1352_v19, %v236_v23 }
 0x192   :  { %v273_v25 = vmax.f32 %v237_v24, 0.0  ;;  %v1446_v24 = vld [vmem:[%s1689_s1 + $0xb0] sm:$0xff] }
 0x194   :  { %921 = vmatmul.msk.f32.gmra.mxu2 %vm69_vm1, %v273_v25 }
 0x197   :  { %v239_v26 = vpop.f32.mrf.mxu1 }
 0x198   :  { %v240_v27 = vadd.f32 %v1352_v19, %v239_v26  ;;  %v1453_v26 = vld [vmem:[%s1689_s1 + $0xb8] sm:$0xff] }
 0x19a   :  { %v274_v28 = vmax.f32 %v240_v27, 0.0 }
 0x19c   :  { %922 = vmatmul.msk.f32.gmra.mxu2 %vm69_vm1, %v274_v28  ;;  %v1460_v28 = vld [vmem:[%s1689_s1 + $0xc0] sm:$0xff] }
 0x19f   :  { %v242_v29 = vpop.f32.mrf.mxu1 }
 0x1a0   :  { %v243_v30 = vadd.f32 %v1352_v19, %v242_v29 }
 0x1a2   :  { %v275_v31 = vmax.f32 %v243_v30, 0.0  ;;  %v1467_v30 = vld [vmem:[%s1689_s1 + $0xc8] sm:$0xf] }
 0x1a4   :  { %923 = vmatmul.msk.f32.gmra.mxu2 %vm69_vm1, %v275_v31 }
 0x1a7   :  { %v245_v32 = vpop.f32.mrf.mxu1 }
 0x1a8   :  { %v246_v33 = vadd.f32 %v1352_v19, %v245_v32 }
 0x1aa   :  { %v276_v34 = vmax.f32 %v246_v33, 0.0 }
 0x1ac   :  { %924 = vmatmul.msk.f32.gmra.mxu2 %vm69_vm1, %v276_v34 }
 0x1af   :  { %v248_v35 = vpop.f32.mrf.mxu1 }
 0x1b0   :  { %v249_v36 = vadd.f32 %v1352_v19, %v248_v35 }
 0x1b2   :  { %v277_v37 = vmax.f32 %v249_v36, 0.0 }
 0x1b4   :  { %925 = vmatmul.msk.f32.gmra.mxu2 %vm69_vm1, %v277_v37 }
 0x1b7   :  { %v251_v38 = vpop.f32.mrf.mxu1 }
 0x1b8   :  { %v252_v39 = vadd.f32 %v1352_v19, %v251_v38 }
 0x1ba   :  { %v278_v40 = vmax.f32 %v252_v39, 0.0 }
 0x1bc   :  { %926 = vmatmul.msk.f32.gmra.mxu2 %vm69_vm1, %v278_v40 }
 0x1bf   :  { %v254_v41 = vpop.f32.mrf.mxu1 }
 0x1c0   :  { %v255_v42 = vadd.f32 %v1352_v19, %v254_v41 }
 0x1c2   :  { %v279_v43 = vmax.f32 %v255_v42, 0.0 }
 0x1c4   :  { %927 = vmatmul.msk.f32.gmra.mxu2 %vm69_vm1, %v279_v43 }
 0x1c7   :  { %v257_v44 = vpop.f32.mrf.mxu1 }
 0x1c8   :  { %v258_v45 = vadd.f32 %v1352_v19, %v257_v44 }
 0x1ca   :  { %v280_v46 = vmax.f32 %v258_v45, 0.0 }
 0x1cc   :  { %928 = vmatmul.msk.f32.gmra.mxu2 %vm69_vm1, %v280_v46 }
 0x1cf   :  { %v260_v47 = vpop.f32.mrf.mxu1 }
 0x1d0   :  { %v261_v48 = vadd.f32 %v1352_v19, %v260_v47 }
 0x1d2   :  { %v281_v49 = vmax.f32 %v261_v48, 0.0 }
 0x1d4   :  { %929 = vmatmul.msk.f32.gmra.mxu2 %vm69_vm1, %v281_v49 }
 0x1d7   :  { %v263_v51 = vpop.f32.mrf.mxu1 }
 0x1d8   :  { %v264_v53 = vadd.f32 %v1352_v19, %v263_v51 }
 0x1da   :  { %v282_v55 = vmax.f32 %v264_v53, 0.0 }
 0x1dc   :  { %930 = vmatmul.msk.f32.gmra.mxu2 %vm69_vm1, %v282_v55 }
 0x1df   :  { %v266_v57 = vpop.f32.mrf.mxu1 }
 0x1e0   :  { %v267_v59 = vadd.f32 %v1352_v19, %v266_v57 }
 0x1e2   :  { %v283_v61 = vmax.f32 %v267_v59, 0.0 }
 0x1e4   :  { %931 = vmatmul.msk.f32.gmra.mxu2 %vm69_vm1, %v283_v61 }
 0x1e7   :  { %v269_v62 = vpop.f32.mrf.mxu1 }
 0x1e8   :  { %v270_v63 = vadd.f32 %v1352_v19, %v269_v62 }
 0x1ea   :  { %v284_v0 = vmax.f32 %v270_v63, 0.0 }
 0x1ec   :  { %932 = vmatmul.msk.f32.gmra.mxu2 %vm69_vm1, %v284_v0 }
 0x1f4   :  { %988 = vmatmul.msk.f32.vlgmr.msrb.gmra.mxu2 %vm172_vm3, %v1383_v1 }
 0x1fc   :  { %989 = vmatmul.msk.f32.gmra.mxu2 %vm172_vm3, %v1390_v3 }
 0x204   :  { %990 = vmatmul.msk.f32.gmra.mxu2 %vm172_vm3, %v1397_v4 }
 0x20c   :  { %991 = vmatmul.msk.f32.gmra.mxu2 %vm172_vm3, %v1404_v5 }
 0x20f   :  { %v344_v6 = vpop.f32.mrf.mxu2 }
 0x214   :  { %992 = vmatmul.msk.f32.gmra.mxu2 %vm172_vm3, %v1411_v7 }
 0x217   :  { %v347_v9 = vpop.f32.mrf.mxu2 }
 0x21c   :  { %993 = vmatmul.msk.f32.gmra.mxu2 %vm172_vm3, %v1418_v10 }
 0x21f   :  { %v350_v12 = vpop.f32.mrf.mxu2 }
 0x224   :  { %994 = vmatmul.msk.f32.gmra.mxu2 %vm172_vm3, %v1425_v14 }
 0x227   :  { %v353_v16 = vpop.f32.mrf.mxu2 }
 0x22c   :  { %995 = vmatmul.msk.f32.gmra.mxu2 %vm172_vm3, %v1432_v20 }
 0x22f   :  { %v356_v21 = vpop.f32.mrf.mxu2 }
 0x234   :  { %996 = vmatmul.msk.f32.gmra.mxu2 %vm172_vm3, %v1439_v22 }
 0x237   :  { %v359_v23 = vpop.f32.mrf.mxu2 }
 0x23c   :  { %997 = vmatmul.msk.f32.gmra.mxu2 %vm172_vm3, %v1446_v24 }
 0x23f   :  { %v362_v25 = vpop.f32.mrf.mxu2 }
 0x244   :  { %998 = vmatmul.msk.f32.gmra.mxu2 %vm172_vm3, %v1453_v26 }
 0x247   :  { %v365_v27 = vpop.f32.mrf.mxu2 }
 0x24c   :  { %999 = vmatmul.msk.f32.gmra.mxu2 %vm172_vm3, %v1460_v28 }
 0x24f   :  { %v368_v29 = vpop.f32.mrf.mxu2 }
 0x254   :  { %1000 = vmatmul.msk.f32.gmra.mxu2 %vm172_vm3, %v1467_v30 }
 0x257   :  { %v371_v31 = vpop.f32.mrf.mxu2 }
 0x25f   :  { %v374_v32 = vpop.f32.mrf.mxu2 }
 0x267   :  { %v377_v33 = vpop.f32.mrf.mxu2 }
 0x26f   :  { %v380_v34 = vpop.f32.mrf.mxu2 }
 0x270   :  { %933 = vmatpush.msk.msra.mxu3 %vm212_vm2, %v380_v34 }
 0x272   :  { %393 = vmatpush.msra.mxu3 %v377_v33 }
 0x274   :  { %394 = vmatpush.msra.mxu3 %v374_v32 }
 0x276   :  { %395 = vmatpush.msra.mxu3 %v371_v31 }
 0x277   :  { %v654_v35 = vpop.f32.mrf.mxu2 }
 0x278   :  { %v655_v36 = vadd.f32 %v1352_v19, %v654_v35  ;;  %396 = vmatpush.msra.mxu3 %v368_v29 }
 0x27a   :  { %v693_v37 = vmax.f32 %v655_v36, 0.0  ;;  %397 = vmatpush.msra.mxu3 %v365_v27 }
 0x27c   :  { %398 = vmatpush.msra.mxu3 %v362_v25  ;;  %1002 = vmatmul.msk.f32.vlgmr.msrb.gmra.mxu1 %vm69_vm1, %v693_v37 }
 0x27e   :  { %399 = vmatpush.msra.mxu3 %v359_v23 }
 0x27f   :  { %v657_v38 = vpop.f32.mrf.mxu2 }
 0x280   :  { %v658_v39 = vadd.f32 %v1352_v19, %v657_v38  ;;  %400 = vmatpush.msra.mxu3 %v356_v21 }
 0x282   :  { %v694_v40 = vmax.f32 %v658_v39, 0.0  ;;  %401 = vmatpush.msra.mxu3 %v353_v16 }
 0x284   :  { %402 = vmatpush.msra.mxu3 %v350_v12  ;;  %1003 = vmatmul.msk.f32.gmra.mxu1 %vm69_vm1, %v694_v40 }
 0x286   :  { %403 = vmatpush.msra.mxu3 %v347_v9 }
 0x287   :  { %v660_v41 = vpop.f32.mrf.mxu2 }
 0x288   :  { %v661_v42 = vadd.f32 %v1352_v19, %v660_v41  ;;  %404 = vmatpush.msra.mxu3 %v344_v6 }
 0x289   :  { %934 = vmatmul.msk.f32.vlgmr.msra.gmra.mxu3 %vm172_vm3, %v1220_v50 }
 0x28a   :  { %v695_v43 = vmax.f32 %v661_v42, 0.0 }
 0x28c   :  { %1004 = vmatmul.msk.f32.gmra.mxu1 %vm69_vm1, %v695_v43 }
 0x28f   :  { %v663_v44 = vpop.f32.mrf.mxu2 }
 0x290   :  { %v664_v45 = vadd.f32 %v1352_v19, %v663_v44 }
 0x291   :  { %935 = vmatmul.msk.f32.gmra.mxu3 %vm172_vm3, %v1229_v52 }
 0x292   :  { %v696_v46 = vmax.f32 %v664_v45, 0.0 }
 0x294   :  { %1005 = vmatmul.msk.f32.gmra.mxu1 %vm69_vm1, %v696_v46 }
 0x297   :  { %v666_v47 = vpop.f32.mrf.mxu2 }
 0x298   :  { %v667_v48 = vadd.f32 %v1352_v19, %v666_v47 }
 0x299   :  { %936 = vmatmul.msk.f32.gmra.mxu3 %vm172_vm3, %v1238_v54 }
 0x29a   :  { %v697_v49 = vmax.f32 %v667_v48, 0.0 }
 0x29c   :  { %1006 = vmatmul.msk.f32.gmra.mxu1 %vm69_vm1, %v697_v49 }
 0x29f   :  { %v669_v50 = vpop.f32.mrf.mxu2 }
 0x2a0   :  { %v670_v51 = vadd.f32 %v1352_v19, %v669_v50 }
 0x2a1   :  { %937 = vmatmul.msk.f32.gmra.mxu3 %vm172_vm3, %v1247_v56 }
 0x2a2   :  { %v698_v53 = vmax.f32 %v670_v51, 0.0 }
 0x2a4   :  { %1007 = vmatmul.msk.f32.gmra.mxu1 %vm69_vm1, %v698_v53 }
 0x2a7   :  { %v672_v52 = vpop.f32.mrf.mxu2 }
 0x2a8   :  { %v673_v55 = vadd.f32 %v1352_v19, %v672_v52 }
 0x2a9   :  { %938 = vmatmul.msk.f32.gmra.mxu3 %vm172_vm3, %v1254_v58 }
 0x2aa   :  { %v699_v57 = vmax.f32 %v673_v55, 0.0 }
 0x2ac   :  { %1008 = vmatmul.msk.f32.gmra.mxu1 %vm69_vm1, %v699_v57 }
 0x2af   :  { %v675_v54 = vpop.f32.mrf.mxu2 }
 0x2b0   :  { %v676_v59 = vadd.f32 %v1352_v19, %v675_v54 }
 0x2b1   :  { %939 = vmatmul.msk.f32.gmra.mxu3 %vm172_vm3, %v1261_v60 }
 0x2b2   :  { %v700_v61 = vmax.f32 %v676_v59, 0.0 }
 0x2b4   :  { %1009 = vmatmul.msk.f32.gmra.mxu1 %vm69_vm1, %v700_v61 }
 0x2b7   :  { %v678_v56 = vpop.f32.mrf.mxu2 }
 0x2b8   :  { %v679_v62 = vadd.f32 %v1352_v19, %v678_v56 }
 0x2b9   :  { %940 = vmatmul.msk.f32.gmra.mxu3 %vm172_vm3, %v1282_v2 }
 0x2ba   :  { %v701_v63 = vmax.f32 %v679_v62, 0.0 }
 0x2bc   :  { %1010 = vmatmul.msk.f32.gmra.mxu1 %vm69_vm1, %v701_v63 }
 0x2bf   :  { %v681_v58 = vpop.f32.mrf.mxu2 }
 0x2c0   :  { %v682_v0 = vadd.f32 %v1352_v19, %v681_v58 }
 0x2c1   :  { %941 = vmatmul.msk.f32.gmra.mxu3 %vm172_vm3, %v1301_v8 }
 0x2c2   :  { %v702_v6 = vmax.f32 %v682_v0, 0.0 }
 0x2c4   :  { %1011 = vmatmul.msk.f32.gmra.mxu1 %vm69_vm1, %v702_v6 }
 0x2c7   :  { %v684_v60 = vpop.f32.mrf.mxu2 }
 0x2c8   :  { %v685_v9 = vadd.f32 %v1352_v19, %v684_v60 }
 0x2c9   :  { %942 = vmatmul.msk.f32.gmra.mxu3 %vm172_vm3, %v1311_v11 }
 0x2ca   :  { %v703_v12 = vmax.f32 %v685_v9, 0.0 }
 0x2cc   :  { %1012 = vmatmul.msk.f32.gmra.mxu1 %vm69_vm1, %v703_v12 }
 0x2cf   :  { %v687_v2 = vpop.f32.mrf.mxu2 }
 0x2d0   :  { %v688_v16 = vadd.f32 %v1352_v19, %v687_v2 }
 0x2d1   :  { %943 = vmatmul.msk.f32.gmra.mxu3 %vm172_vm3, %v1318_v13 }
 0x2d2   :  { %v704_v21 = vmax.f32 %v688_v16, 0.0 }
 0x2d4   :  { %1013 = vmatmul.msk.f32.gmra.mxu1 %vm69_vm1, %v704_v21 }
 0x2d7   :  { %v690_v8 = vpop.f32.mrf.mxu2 }
 0x2d8   :  { %v691_v23 = vadd.f32 %v1352_v19, %v690_v8 }
 0x2d9   :  { %944 = vmatmul.msk.f32.gmra.mxu3 %vm172_vm3, %v1325_v15 }
 0x2da   :  { %v705_v25 = vmax.f32 %v691_v23, 0.0 }
 0x2dc   :  { %1014 = vmatmul.msk.f32.gmra.mxu1 %vm69_vm1, %v705_v25 }
 0x2e1   :  { %945 = vmatmul.msk.f32.gmra.mxu3 %vm172_vm3, %v1333_v17  ;;  %v1528_v17 = vld [vmem:[%s1691_s5] ss:$0 sm:$0xff] }
 0x2e9   :  { %946 = vmatmul.msk.f32.gmra.mxu3 %vm172_vm3, %v1340_v18 }
 0x2f9   :  { %v762_v11 = vpop.f32.mrf.mxu1 }
 0x301   :  { %v765_v13 = vpop.f32.mrf.mxu1 }
 0x309   :  { %v768_v27 = vpop.f32.mrf.mxu1 }
 0x30c   :  { %v406_v18 = vpop.f32.mrf.mxu3 }
 0x30d   :  { %v407_v38 = vadd.f32 %v1528_v17, %v406_v18 }
 0x30f   :  { %v445_v39 = vmax.f32 %v407_v38, 0.0 }
 0x311   :  { %v771_v29 = vpop.f32.mrf.mxu1  ;;  %458 = vst.msk [vmem:[%s1692_s6] sm:$0xff] %vm69_vm1, %v445_v39 }
 0x314   :  { %v409_v40 = vpop.f32.mrf.mxu3 }
 0x315   :  { %v410_v41 = vadd.f32 %v1528_v17, %v409_v40 }
 0x317   :  { %v446_v42 = vmax.f32 %v410_v41, 0.0 }
 0x319   :  { %v774_v31 = vpop.f32.mrf.mxu1  ;;  %459 = vst.msk [vmem:[%s1692_s6 + $0x8] sm:$0xff] %vm69_vm1, %v446_v42 }
 0x31c   :  { %v412_v43 = vpop.f32.mrf.mxu3 }
 0x31d   :  { %v413_v44 = vadd.f32 %v1528_v17, %v412_v43 }
 0x31f   :  { %v447_v45 = vmax.f32 %v413_v44, 0.0 }
 0x321   :  { %v777_v32 = vpop.f32.mrf.mxu1  ;;  %460 = vst.msk [vmem:[%s1692_s6 + $0x10] sm:$0xff] %vm69_vm1, %v447_v45 }
 0x329   :  { %v780_v33 = vpop.f32.mrf.mxu1 }
 0x331   :  { %v783_v19 = vpop.f32.mrf.mxu1 }
 0x339   :  { %v786_v34 = vpop.f32.mrf.mxu1 }
 0x341   :  { %v789_v35 = vpop.f32.mrf.mxu1 }
 0x349   :  { %v792_v15 = vpop.f32.mrf.mxu1 }
 0x351   :  { %v795_v36 = vpop.f32.mrf.mxu1 }
 0x359   :  { %v798_v37 = vpop.f32.mrf.mxu1 }
 0x35a   :  { %1015 = vmatpush.msk.msrb.mxu3 %vm212_vm2, %v798_v37 }
 0x35c   :  { %808 = vmatpush.msrb.mxu3 %v795_v36 }
 0x35e   :  { %809 = vmatpush.msrb.mxu3 %v792_v15 }
 0x360   :  { %810 = vmatpush.msrb.mxu3 %v789_v35 }
 0x362   :  { %811 = vmatpush.msrb.mxu3 %v786_v34 }
 0x364   :  { %812 = vmatpush.msrb.mxu3 %v783_v19 }
 0x366   :  { %813 = vmatpush.msrb.mxu3 %v780_v33 }
 0x368   :  { %814 = vmatpush.msrb.mxu3 %v777_v32 }
 0x36a   :  { %815 = vmatpush.msrb.mxu3 %v774_v31 }
 0x36c   :  { %816 = vmatpush.msrb.mxu3 %v771_v29 }
 0x36e   :  { %817 = vmatpush.msrb.mxu3 %v768_v27 }
 0x370   :  { %818 = vmatpush.msrb.mxu3 %v765_v13 }
 0x372   :  { %819 = vmatpush.msrb.mxu3 %v762_v11 }
 0x373   :  { %1016 = vmatmul.msk.f32.vlgmr.msrb.gmra.mxu3 %vm172_vm3, %v1383_v1  ;;  %v415_v1 = vpop.f32.mrf.mxu3 }
 0x374   :  { %v416_v46 = vadd.f32 %v1528_v17, %v415_v1 }
 0x376   :  { %v448_v47 = vmax.f32 %v416_v46, 0.0 }
 0x378   :  { %461 = vst.msk [vmem:[%s1692_s6 + $0x18] sm:$0xff] %vm69_vm1, %v448_v47 }
 0x37b   :  { %1017 = vmatmul.msk.f32.gmra.mxu3 %vm172_vm3, %v1390_v3  ;;  %v418_v3 = vpop.f32.mrf.mxu3 }
 0x37c   :  { %v419_v48 = vadd.f32 %v1528_v17, %v418_v3 }
 0x37e   :  { %v449_v49 = vmax.f32 %v419_v48, 0.0 }
 0x380   :  { %462 = vst.msk [vmem:[%s1692_s6 + $0x20] sm:$0xff] %vm69_vm1, %v449_v49 }
 0x383   :  { %1018 = vmatmul.msk.f32.gmra.mxu3 %vm172_vm3, %v1397_v4  ;;  %v421_v4 = vpop.f32.mrf.mxu3 }
 0x384   :  { %v422_v50 = vadd.f32 %v1528_v17, %v421_v4 }
 0x386   :  { %v450_v51 = vmax.f32 %v422_v50, 0.0 }
 0x388   :  { %463 = vst.msk [vmem:[%s1692_s6 + $0x28] sm:$0xff] %vm69_vm1, %v450_v51 }
 0x38b   :  { %1019 = vmatmul.msk.f32.gmra.mxu3 %vm172_vm3, %v1404_v5  ;;  %v424_v5 = vpop.f32.mrf.mxu3 }
 0x38c   :  { %v425_v53 = vadd.f32 %v1528_v17, %v424_v5 }
 0x38e   :  { %v451_v52 = vmax.f32 %v425_v53, 0.0 }
 0x390   :  { %464 = vst.msk [vmem:[%s1692_s6 + $0x30] sm:$0xff] %vm69_vm1, %v451_v52 }
 0x393   :  { %1020 = vmatmul.msk.f32.gmra.mxu3 %vm172_vm3, %v1411_v7  ;;  %v427_v7 = vpop.f32.mrf.mxu3 }
 0x394   :  { %v428_v55 = vadd.f32 %v1528_v17, %v427_v7 }
 0x396   :  { %v452_v57 = vmax.f32 %v428_v55, 0.0 }
 0x398   :  { %465 = vst.msk [vmem:[%s1692_s6 + $0x38] sm:$0xff] %vm69_vm1, %v452_v57 }
 0x39b   :  { %1021 = vmatmul.msk.f32.gmra.mxu3 %vm172_vm3, %v1418_v10  ;;  %v430_v10 = vpop.f32.mrf.mxu3 }
 0x39c   :  { %v431_v54 = vadd.f32 %v1528_v17, %v430_v10 }
 0x39e   :  { %v453_v59 = vmax.f32 %v431_v54, 0.0 }
 0x3a0   :  { %466 = vst.msk [vmem:[%s1692_s6 + $0x40] sm:$0xff] %vm69_vm1, %v453_v59 }
 0x3a3   :  { %1022 = vmatmul.msk.f32.gmra.mxu3 %vm172_vm3, %v1425_v14  ;;  %v433_v14 = vpop.f32.mrf.mxu3 }
 0x3a4   :  { %v434_v61 = vadd.f32 %v1528_v17, %v433_v14 }
 0x3a6   :  { %v454_v56 = vmax.f32 %v434_v61, 0.0 }
 0x3a8   :  { %467 = vst.msk [vmem:[%s1692_s6 + $0x48] sm:$0xff] %vm69_vm1, %v454_v56 }
 0x3ab   :  { %1023 = vmatmul.msk.f32.gmra.mxu3 %vm172_vm3, %v1432_v20  ;;  %v436_v20 = vpop.f32.mrf.mxu3 }
 0x3ac   :  { %v437_v62 = vadd.f32 %v1528_v17, %v436_v20 }
 0x3ae   :  { %v455_v63 = vmax.f32 %v437_v62, 0.0 }
 0x3b0   :  { %468 = vst.msk [vmem:[%s1692_s6 + $0x50] sm:$0xff] %vm69_vm1, %v455_v63 }
 0x3b3   :  { %1024 = vmatmul.msk.f32.gmra.mxu3 %vm172_vm3, %v1439_v22  ;;  %v439_v22 = vpop.f32.mrf.mxu3 }
 0x3b4   :  { %v440_v58 = vadd.f32 %v1528_v17, %v439_v22 }
 0x3b6   :  { %v456_v0 = vmax.f32 %v440_v58, 0.0 }
 0x3b8   :  { %469 = vst.msk [vmem:[%s1692_s6 + $0x58] sm:$0xff] %vm69_vm1, %v456_v0 }
 0x3bb   :  { %1025 = vmatmul.msk.f32.gmra.mxu3 %vm172_vm3, %v1446_v24  ;;  %v442_v24 = vpop.f32.mrf.mxu3 }
 0x3bc   :  { %v443_v6 = vadd.f32 %v1528_v17, %v442_v24 }
 0x3be   :  { %v457_v60 = vmax.f32 %v443_v6, 0.0 }
 0x3c0   :  { %471 = vst.msk [vmem:[%s1692_s6 + $0x60] sm:$0xf] %vm470_vm4, %v457_v60 }
 0x3c3   :  { %1026 = vmatmul.msk.f32.gmra.mxu3 %vm172_vm3, %v1453_v26 }
 0x3cb   :  { %1027 = vmatmul.msk.f32.gmra.mxu3 %vm172_vm3, %v1460_v28 }
 0x3d3   :  { %1028 = vmatmul.msk.f32.gmra.mxu3 %vm172_vm3, %v1467_v30 }
 0x3f6   :  { %v821_v26 = vpop.f32.mrf.mxu3 }
 0x3f7   :  { %v822_v9 = vadd.f32 %v1528_v17, %v821_v26 }
 0x3f9   :  { %v860_v12 = vmax.f32 %v822_v9, 0.0 }
 0x3fb   :  { %1029 = vst.msk [vmem:[%s1692_s6 + $0x68] sm:$0xff] %vm69_vm1, %v860_v12 }
 0x3fe   :  { %v824_v28 = vpop.f32.mrf.mxu3 }
 0x3ff   :  { %v825_v2 = vadd.f32 %v1528_v17, %v824_v28 }
 0x401   :  { %v861_v16 = vmax.f32 %v825_v2, 0.0 }
 0x403   :  { %1030 = vst.msk [vmem:[%s1692_s6 + $0x70] sm:$0xff] %vm69_vm1, %v861_v16 }
 0x406   :  { %v827_v21 = vpop.f32.mrf.mxu3 }
 0x407   :  { %v828_v30 = vadd.f32 %v1528_v17, %v827_v21 }
 0x409   :  { %v862_v8 = vmax.f32 %v828_v30, 0.0 }
 0x40b   :  { %1031 = vst.msk [vmem:[%s1692_s6 + $0x78] sm:$0xff] %vm69_vm1, %v862_v8 }
 0x40e   :  { %v830_v23 = vpop.f32.mrf.mxu3 }
 0x40f   :  { %v831_v25 = vadd.f32 %v1528_v17, %v830_v23 }
 0x411   :  { %v863_v11 = vmax.f32 %v831_v25, 0.0 }
 0x413   :  { %1032 = vst.msk [vmem:[%s1692_s6 + $0x80] sm:$0xff] %vm69_vm1, %v863_v11 }
 0x416   :  { %v833_v13 = vpop.f32.mrf.mxu3 }
 0x417   :  { %v834_v27 = vadd.f32 %v1528_v17, %v833_v13 }
 0x419   :  { %v864_v29 = vmax.f32 %v834_v27, 0.0 }
 0x41b   :  { %1033 = vst.msk [vmem:[%s1692_s6 + $0x88] sm:$0xff] %vm69_vm1, %v864_v29 }
 0x41e   :  { %v836_v31 = vpop.f32.mrf.mxu3 }
 0x41f   :  { %v837_v32 = vadd.f32 %v1528_v17, %v836_v31 }
 0x421   :  { %v865_v33 = vmax.f32 %v837_v32, 0.0 }
 0x423   :  { %1034 = vst.msk [vmem:[%s1692_s6 + $0x90] sm:$0xff] %vm69_vm1, %v865_v33 }
 0x426   :  { %v839_v19 = vpop.f32.mrf.mxu3 }
 0x427   :  { %v840_v34 = vadd.f32 %v1528_v17, %v839_v19 }
 0x429   :  { %v866_v35 = vmax.f32 %v840_v34, 0.0 }
 0x42b   :  { %1035 = vst.msk [vmem:[%s1692_s6 + $0x98] sm:$0xff] %vm69_vm1, %v866_v35 }
 0x42e   :  { %v842_v15 = vpop.f32.mrf.mxu3 }
 0x42f   :  { %v843_v36 = vadd.f32 %v1528_v17, %v842_v15 }
 0x431   :  { %v867_v37 = vmax.f32 %v843_v36, 0.0 }
 0x433   :  { %1036 = vst.msk [vmem:[%s1692_s6 + $0xa0] sm:$0xff] %vm69_vm1, %v867_v37 }
 0x436   :  { %v845_v18 = vpop.f32.mrf.mxu3 }
 0x437   :  { %v846_v38 = vadd.f32 %v1528_v17, %v845_v18 }
 0x439   :  { %v868_v39 = vmax.f32 %v846_v38, 0.0 }
 0x43b   :  { %1037 = vst.msk [vmem:[%s1692_s6 + $0xa8] sm:$0xff] %vm69_vm1, %v868_v39 }
 0x43e   :  { %v848_v40 = vpop.f32.mrf.mxu3 }
 0x43f   :  { %v849_v41 = vadd.f32 %v1528_v17, %v848_v40 }
 0x441   :  { %v869_v42 = vmax.f32 %v849_v41, 0.0 }
 0x443   :  { %1038 = vst.msk [vmem:[%s1692_s6 + $0xb0] sm:$0xff] %vm69_vm1, %v869_v42 }
 0x446   :  { %v851_v43 = vpop.f32.mrf.mxu3 }
 0x447   :  { %v852_v44 = vadd.f32 %v1528_v17, %v851_v43 }
 0x449   :  { %v870_v45 = vmax.f32 %v852_v44, 0.0 }
 0x44b   :  { %1039 = vst.msk [vmem:[%s1692_s6 + $0xb8] sm:$0xff] %vm69_vm1, %v870_v45 }
 0x44e   :  { %v854_v1 = vpop.f32.mrf.mxu3 }
 0x44f   :  { %v855_v46 = vadd.f32 %v1528_v17, %v854_v1 }
 0x451   :  { %v871_v47 = vmax.f32 %v855_v46, 0.0 }
 0x453   :  { %1040 = vst.msk [vmem:[%s1692_s6 + $0xc0] sm:$0xff] %vm69_vm1, %v871_v47 }
 0x456   :  { %v857_v3 = vpop.f32.mrf.mxu3 }
 0x457   :  { %v858_v48 = vadd.f32 %v1528_v17, %v857_v3 }
 0x459   :  { %v872_v49 = vmax.f32 %v858_v48, 0.0 }
 0x45b   :  { %1041 = vst.msk [vmem:[%s1692_s6 + $0xc8] sm:$0xf] %vm470_vm4, %v872_v49 }

</bundles_post_ra>
